<compile_context>
chip_gen: v6e
topology: v6e:2x2x1
jax: 0.10.0
libtpu: 0.0.40
codegen_flags: <defaults>
</compile_context>

<pallas_src>
import functools

import jax
import jax.numpy as jnp
from jax import lax
from jax.experimental import pallas as pl
from jax.experimental.pallas import tpu as pltpu


def _conv3x3_kernel(xm_ref, xh1_ref, xh2_ref, w_ref, b_ref, o_ref):
    """One (batch, row-strip) tile of a 3x3 'same' conv (stride=1, padding=1).

    xm_ref : (1, TH,  W+2, Cin) bf16   padded rows [s*TH, s*TH+TH)
    xh1_ref: (1, 1,   W+2, Cin) bf16   padded row   s*TH+TH      (halo)
    xh2_ref: (1, 1,   W+2, Cin) bf16   padded row   s*TH+TH+1    (halo)
    w_ref  : (9, Cin, Cout)     bf16   tap-major weights (leading index = ky*3+kx)
    b_ref  : (1, Cout)          f32
    o_ref  : (1, TH, W, Cout)   bf16
    """
    TH = xm_ref.shape[1]
    Wp2, Cin = xm_ref.shape[2], xm_ref.shape[3]
    W = Wp2 - 2
    Cout = o_ref.shape[3]

    # Stitch the (TH+2)-row strip from the three Blocked windows (major-axis concat,
    # no lane movement).  This replaces the old host-side overlapping-strip HBM pass.
    xs = jnp.concatenate([xm_ref[0], xh1_ref[0], xh2_ref[0]], axis=0)  # (TH+2, W+2, Cin)

    # 9 accumulated MXU matmuls with K = Cin — no 9*Cin lane-concat patch buffer.
    # TODO(synk): for small Cin on v6e, group taps per ky (K = 3*Cin) to fill the MXU deeper.
    acc = jnp.zeros((TH * W, Cout), jnp.float32)
    for ky in range(3):
        for kx in range(3):
            tap = xs[ky:ky + TH, kx:kx + W, :].reshape(TH * W, Cin)
            acc = acc + jnp.dot(tap, w_ref[ky * 3 + kx],
                                preferred_element_type=jnp.float32)

    acc = acc + b_ref[...]                                   # (1, Cout) broadcast
    # TODO(synk): when Cout < 128 this store is lane-masked; folding W into the lane axis
    # would make it dense but costs an in-kernel relayout (stores are a small fraction of
    # the per-step traffic here, so left as-is).
    o_ref[0] = acc.reshape(TH, W, Cout).astype(o_ref.dtype)


def _vmem_cap_bytes():
    """Per-core VMEM budget the kernel may claim (generation aware, safe fallback)."""
    try:
        cap = int(pltpu.get_tpu_info().vmem_capacity_bytes)
    except Exception:
        cap = 64 * 1024 * 1024          # assume the smallest (v7x-like) VMEM if unknown
    # >=25% headroom for compiler scratch; never request more than ~96 MiB (v5e/v6e),
    # and at most 48 MiB on 64 MiB (v7x) parts.
    return min((cap * 3) // 4, 96 * 1024 * 1024)


def _step_vmem_bytes(th, W, Cin, Cout):
    """Approximate VMEM working set of one grid step (incl. double buffering)."""
    x_db = 2 * (th + 2) * (W + 2) * Cin * 2          # double-buffered bf16 input windows
    o_db = 2 * th * W * Cout * 2                     # double-buffered bf16 output block
    wgt = 9 * Cin * Cout * 2 + Cout * 4              # single-buffered weights + bias
    strip = (th + 2) * (W + 2) * Cin * 2             # stitched strip value
    acc = th * W * Cout * 4                          # f32 accumulator
    tap = th * W * Cin * 2                           # one materialized tap operand
    return x_db + o_db + wgt + strip + acc + tap


def _pick_row_tile(H, W, Cin, Cout, vmem_cap):
    """Largest divisor of H whose per-step working set fits comfortably in VMEM."""
    budget = vmem_cap // 2
    best = 1
    for th in range(1, H + 1):
        if H % th == 0 and _step_vmem_bytes(th, W, Cin, Cout) <= budget:
            best = th
    return best


@functools.partial(jax.jit, static_argnames=("row_tile",))
def padded_conv2d_forward(x_nchw, w_hwio, bias, *, row_tile=None):
    """y = conv2d(x, w, stride=1, padding=1) + bias.  NCHW in / NCHW out."""
    B, Cin, H, W = x_nchw.shape
    Cout = w_hwio.shape[-1]

    vmem_cap = _vmem_cap_bytes()
    TH = _pick_row_tile(H, W, Cin, Cout, vmem_cap) if row_tile is None else int(row_tile)
    assert H % TH == 0, (H, TH)
    nS = H // TH

    # NCHW -> NHWC (channels on lanes), bf16 MXU operand, zero spatial padding.
    x = jnp.transpose(x_nchw, (0, 2, 3, 1)).astype(jnp.bfloat16)
    xp = jnp.pad(x, ((0, 0), (1, 1), (1, 1), (0, 0)))            # (B, H+2, W+2, Cin)

    w9 = w_hwio.reshape(9, Cin, Cout).astype(jnp.bfloat16)       # tap-major weights
    b2 = bias.reshape(1, Cout).astype(jnp.float32)

    const_kwargs = {"pipeline_mode": pl.Buffered(1)} if hasattr(pl, "Buffered") else {}

    flops = 2 * B * H * W * 9 * Cin * Cout
    bytes_accessed = (B * (H + 2) * (W + 2) * Cin * 2            # padded bf16 input
                      + 9 * Cin * Cout * 2 + Cout * 4            # weights + bias
                      + B * H * W * Cout * 2)                    # bf16 output
    cost = pl.CostEstimate(flops=flops, transcendentals=0,
                           bytes_accessed=bytes_accessed)

    vmem_limit = int(min(max(2 * _step_vmem_bytes(TH, W, Cin, Cout),
                             32 * 1024 * 1024), vmem_cap))

    out = pl.pallas_call(
        _conv3x3_kernel,
        out_shape=jax.ShapeDtypeStruct((B, H, W, Cout), jnp.bfloat16),
        grid_spec=pltpu.PrefetchScalarGridSpec(
            num_scalar_prefetch=0,
            grid=(B, nS),
            in_specs=[
                # TH-row window of the padded image (plain Blocked indexing).
                pl.BlockSpec((1, TH, W + 2, Cin), lambda b, s: (b, s, 0, 0)),
                # Two 1-row halo windows = first two rows of the next strip.  Same array,
                # plain Blocked indexing -> no overlapping-window trick, no extra HBM pass,
                # full auto double-buffering, "parallel"-safe.
                pl.BlockSpec((1, 1, W + 2, Cin),
                             lambda b, s: (b, (s + 1) * TH, 0, 0)),
                pl.BlockSpec((1, 1, W + 2, Cin),
                             lambda b, s: (b, (s + 1) * TH + 1, 0, 0)),
                # Loop-invariant weights / bias, single-buffered.
                pl.BlockSpec((9, Cin, Cout), lambda b, s: (0, 0, 0), **const_kwargs),
                pl.BlockSpec((1, Cout), lambda b, s: (0, 0), **const_kwargs),
            ],
            out_specs=pl.BlockSpec((1, TH, W, Cout), lambda b, s: (b, s, 0, 0)),
        ),
        compiler_params=pltpu.CompilerParams(
            dimension_semantics=("parallel", "parallel"),
            vmem_limit_bytes=vmem_limit),
        cost_estimate=cost,
    )(xp, xp, xp, w9, b2)

    # Back to the module's NCHW / f32 interface (single fused transpose+cast pass).
    return jnp.transpose(out, (0, 3, 1, 2)).astype(jnp.float32)


# ---------------- pure-JAX f32 reference (mirrors PyTorch Conv2d, padding=1) ----------------

def conv_reference(x_nchw, w_hwio, bias):
    y = lax.conv_general_dilated(
        x_nchw.astype(jnp.float32), w_hwio.astype(jnp.float32),
        window_strides=(1, 1), padding=((1, 1), (1, 1)),
        dimension_numbers=("NCHW", "HWIO", "NCHW"))
    return y + bias.reshape(1, -1, 1, 1)


if __name__ == "__main__":
    B, Cin, Cout, H, W = 2, 32, 64, 16, 16

    key = jax.random.PRNGKey(0)
    k_x, k_w, k_b = jax.random.split(key, 3)
    x = jax.random.normal(k_x, (B, Cin, H, W), dtype=jnp.float32)               # NCHW
    w = (jax.random.normal(k_w, (3, 3, Cin, Cout)) * 0.05).astype(jnp.float32)  # HWIO
    b = (jax.random.normal(k_b, (Cout,)) * 0.02).astype(jnp.float32)

    ref = conv_reference(x, w, b)

    # Multi-strip path (exercises the Blocked-halo stitching across row strips).
    out = jax.block_until_ready(padded_conv2d_forward(x, w, b, row_tile=4))
    assert out.shape == (B, Cout, H, W), out.shape
    max_err = float(jnp.max(jnp.abs(out - ref)))
    assert bool(jnp.allclose(out, ref, atol=3e-2, rtol=2e-2)), max_err

    # Auto row-tile path (whole-image strip for this small shape).
    out2 = jax.block_until_ready(padded_conv2d_forward(x, w, b))
    max_err2 = float(jnp.max(jnp.abs(out2 - ref)))
    assert bool(jnp.allclose(out2, ref, atol=3e-2, rtol=2e-2)), max_err2

    print("KERNEL_OK")
</pallas_src>

<mosaic_0001>
module attributes {stable_mosaic.version = 11 : i64} {
  func.func @_conv3x3_kernel(%arg0: i32, %arg1: i32, %arg2: memref<1x4x18x32xbf16, #tpu.memory_space<vmem>>, %arg3: memref<1x1x18x32xbf16, #tpu.memory_space<vmem>>, %arg4: memref<1x1x18x32xbf16, #tpu.memory_space<vmem>>, %arg5: memref<9x32x64xbf16, #tpu.memory_space<vmem>>, %arg6: memref<1x64xf32, #tpu.memory_space<vmem>>, %arg7: memref<1x4x16x64xbf16, #tpu.memory_space<vmem>>) attributes {dimension_semantics = [#tpu.dimension_semantics<parallel>, #tpu.dimension_semantics<parallel>], iteration_bounds = array<i64: 2, 4>, scalar_prefetch = 0 : i64, scratch_operands = 0 : i64, tpu.core_type = #tpu.core_type<tc>, window_params = [{transform_indices = @transform_0, window_bounds = array<i64: 1, 4, 18, 32>}, {transform_indices = @transform_1, window_bounds = array<i64: 1, 1, 18, 32>}, {transform_indices = @transform_2, window_bounds = array<i64: 1, 1, 18, 32>}, {pipeline_mode = #tpu.pipeline_mode<synchronous>, transform_indices = @transform_3, window_bounds = array<i64: 9, 32, 64>}, {pipeline_mode = #tpu.pipeline_mode<synchronous>, transform_indices = @transform_4, window_bounds = array<i64: 1, 64>}, {transform_indices = @transform_5, window_bounds = array<i64: 1, 4, 16, 64>}]} {
    %c0 = arith.constant 0 : index
    %c0_0 = arith.constant 0 : index
    %c0_1 = arith.constant 0 : index
    %c0_2 = arith.constant 0 : index
    %0 = vector.load %arg2[%c0, %c0_0, %c0_1, %c0_2] : memref<1x4x18x32xbf16, #tpu.memory_space<vmem>>, vector<1x4x18x32xbf16>
    %1 = vector.shape_cast %0 : vector<1x4x18x32xbf16> to vector<4x18x32xbf16>
    %c0_3 = arith.constant 0 : index
    %c0_4 = arith.constant 0 : index
    %c0_5 = arith.constant 0 : index
    %c0_6 = arith.constant 0 : index
    %2 = vector.load %arg3[%c0_3, %c0_4, %c0_5, %c0_6] : memref<1x1x18x32xbf16, #tpu.memory_space<vmem>>, vector<1x1x18x32xbf16>
    %3 = vector.shape_cast %2 : vector<1x1x18x32xbf16> to vector<1x18x32xbf16>
    %c0_7 = arith.constant 0 : index
    %c0_8 = arith.constant 0 : index
    %c0_9 = arith.constant 0 : index
    %c0_10 = arith.constant 0 : index
    %4 = vector.load %arg4[%c0_7, %c0_8, %c0_9, %c0_10] : memref<1x1x18x32xbf16, #tpu.memory_space<vmem>>, vector<1x1x18x32xbf16>
    %5 = vector.shape_cast %4 : vector<1x1x18x32xbf16> to vector<1x18x32xbf16>
    %6 = tpu.concatenate %1, %3, %5 in 0 : vector<4x18x32xbf16>, vector<1x18x32xbf16>, vector<1x18x32xbf16> -> vector<6x18x32xbf16>
    %cst = arith.constant 0.000000e+00 : f32
    %7 = vector.broadcast %cst : f32 to vector<64x64xf32>
    %8 = vector.extract_strided_slice %6 {offsets = [0, 0, 0], sizes = [4, 16, 32], strides = [1, 1, 1]} : vector<6x18x32xbf16> to vector<4x16x32xbf16>
    %9 = vector.shape_cast %8 : vector<4x16x32xbf16> to vector<64x32xbf16>
    %c0_11 = arith.constant 0 : index
    %c0_12 = arith.constant 0 : index
    %c0_13 = arith.constant 0 : index
    %10 = vector.load %arg5[%c0_11, %c0_12, %c0_13] : memref<9x32x64xbf16, #tpu.memory_space<vmem>>, vector<1x32x64xbf16>
    %11 = vector.shape_cast %10 : vector<1x32x64xbf16> to vector<32x64xbf16>
    %cst_14 = arith.constant dense<0.000000e+00> : vector<64x64xf32>
    %12 = tpu.matmul %9, %11, %cst_14 {dimension_numbers = #tpu.dot_dimension_numbers<[1], [0], [0], [1], [0, 0, 1, 1], [], []>} : vector<64x32xbf16>, vector<32x64xbf16>, vector<64x64xf32> -> vector<64x64xf32>
    %13 = arith.addf %7, %12 : vector<64x64xf32>
    %14 = vector.extract_strided_slice %6 {offsets = [0, 1, 0], sizes = [4, 16, 32], strides = [1, 1, 1]} : vector<6x18x32xbf16> to vector<4x16x32xbf16>
    %15 = vector.shape_cast %14 : vector<4x16x32xbf16> to vector<64x32xbf16>
    %c1 = arith.constant 1 : index
    %c0_15 = arith.constant 0 : index
    %c0_16 = arith.constant 0 : index
    %16 = vector.load %arg5[%c1, %c0_15, %c0_16] : memref<9x32x64xbf16, #tpu.memory_space<vmem>>, vector<1x32x64xbf16>
    %17 = vector.shape_cast %16 : vector<1x32x64xbf16> to vector<32x64xbf16>
    %cst_17 = arith.constant dense<0.000000e+00> : vector<64x64xf32>
    %18 = tpu.matmul %15, %17, %cst_17 {dimension_numbers = #tpu.dot_dimension_numbers<[1], [0], [0], [1], [0, 0, 1, 1], [], []>} : vector<64x32xbf16>, vector<32x64xbf16>, vector<64x64xf32> -> vector<64x64xf32>
    %19 = arith.addf %13, %18 : vector<64x64xf32>
    %20 = vector.extract_strided_slice %6 {offsets = [0, 2, 0], sizes = [4, 16, 32], strides = [1, 1, 1]} : vector<6x18x32xbf16> to vector<4x16x32xbf16>
    %21 = vector.shape_cast %20 : vector<4x16x32xbf16> to vector<64x32xbf16>
    %c2 = arith.constant 2 : index
    %c0_18 = arith.constant 0 : index
    %c0_19 = arith.constant 0 : index
    %22 = vector.load %arg5[%c2, %c0_18, %c0_19] : memref<9x32x64xbf16, #tpu.memory_space<vmem>>, vector<1x32x64xbf16>
    %23 = vector.shape_cast %22 : vector<1x32x64xbf16> to vector<32x64xbf16>
    %cst_20 = arith.constant dense<0.000000e+00> : vector<64x64xf32>
    %24 = tpu.matmul %21, %23, %cst_20 {dimension_numbers = #tpu.dot_dimension_numbers<[1], [0], [0], [1], [0, 0, 1, 1], [], []>} : vector<64x32xbf16>, vector<32x64xbf16>, vector<64x64xf32> -> vector<64x64xf32>
    %25 = arith.addf %19, %24 : vector<64x64xf32>
    %26 = vector.extract_strided_slice %6 {offsets = [1, 0, 0], sizes = [4, 16, 32], strides = [1, 1, 1]} : vector<6x18x32xbf16> to vector<4x16x32xbf16>
    %27 = vector.shape_cast %26 : vector<4x16x32xbf16> to vector<64x32xbf16>
    %c3 = arith.constant 3 : index
    %c0_21 = arith.constant 0 : index
    %c0_22 = arith.constant 0 : index
    %28 = vector.load %arg5[%c3, %c0_21, %c0_22] : memref<9x32x64xbf16, #tpu.memory_space<vmem>>, vector<1x32x64xbf16>
    %29 = vector.shape_cast %28 : vector<1x32x64xbf16> to vector<32x64xbf16>
    %cst_23 = arith.constant dense<0.000000e+00> : vector<64x64xf32>
    %30 = tpu.matmul %27, %29, %cst_23 {dimension_numbers = #tpu.dot_dimension_numbers<[1], [0], [0], [1], [0, 0, 1, 1], [], []>} : vector<64x32xbf16>, vector<32x64xbf16>, vector<64x64xf32> -> vector<64x64xf32>
    %31 = arith.addf %25, %30 : vector<64x64xf32>
    %32 = vector.extract_strided_slice %6 {offsets = [1, 1, 0], sizes = [4, 16, 32], strides = [1, 1, 1]} : vector<6x18x32xbf16> to vector<4x16x32xbf16>
    %33 = vector.shape_cast %32 : vector<4x16x32xbf16> to vector<64x32xbf16>
    %c4 = arith.constant 4 : index
    %c0_24 = arith.constant 0 : index
    %c0_25 = arith.constant 0 : index
    %34 = vector.load %arg5[%c4, %c0_24, %c0_25] : memref<9x32x64xbf16, #tpu.memory_space<vmem>>, vector<1x32x64xbf16>
    %35 = vector.shape_cast %34 : vector<1x32x64xbf16> to vector<32x64xbf16>
    %cst_26 = arith.constant dense<0.000000e+00> : vector<64x64xf32>
    %36 = tpu.matmul %33, %35, %cst_26 {dimension_numbers = #tpu.dot_dimension_numbers<[1], [0], [0], [1], [0, 0, 1, 1], [], []>} : vector<64x32xbf16>, vector<32x64xbf16>, vector<64x64xf32> -> vector<64x64xf32>
    %37 = arith.addf %31, %36 : vector<64x64xf32>
    %38 = vector.extract_strided_slice %6 {offsets = [1, 2, 0], sizes = [4, 16, 32], strides = [1, 1, 1]} : vector<6x18x32xbf16> to vector<4x16x32xbf16>
    %39 = vector.shape_cast %38 : vector<4x16x32xbf16> to vector<64x32xbf16>
    %c5 = arith.constant 5 : index
    %c0_27 = arith.constant 0 : index
    %c0_28 = arith.constant 0 : index
    %40 = vector.load %arg5[%c5, %c0_27, %c0_28] : memref<9x32x64xbf16, #tpu.memory_space<vmem>>, vector<1x32x64xbf16>
    %41 = vector.shape_cast %40 : vector<1x32x64xbf16> to vector<32x64xbf16>
    %cst_29 = arith.constant dense<0.000000e+00> : vector<64x64xf32>
    %42 = tpu.matmul %39, %41, %cst_29 {dimension_numbers = #tpu.dot_dimension_numbers<[1], [0], [0], [1], [0, 0, 1, 1], [], []>} : vector<64x32xbf16>, vector<32x64xbf16>, vector<64x64xf32> -> vector<64x64xf32>
    %43 = arith.addf %37, %42 : vector<64x64xf32>
    %44 = vector.extract_strided_slice %6 {offsets = [2, 0, 0], sizes = [4, 16, 32], strides = [1, 1, 1]} : vector<6x18x32xbf16> to vector<4x16x32xbf16>
    %45 = vector.shape_cast %44 : vector<4x16x32xbf16> to vector<64x32xbf16>
    %c6 = arith.constant 6 : index
    %c0_30 = arith.constant 0 : index
    %c0_31 = arith.constant 0 : index
    %46 = vector.load %arg5[%c6, %c0_30, %c0_31] : memref<9x32x64xbf16, #tpu.memory_space<vmem>>, vector<1x32x64xbf16>
    %47 = vector.shape_cast %46 : vector<1x32x64xbf16> to vector<32x64xbf16>
    %cst_32 = arith.constant dense<0.000000e+00> : vector<64x64xf32>
    %48 = tpu.matmul %45, %47, %cst_32 {dimension_numbers = #tpu.dot_dimension_numbers<[1], [0], [0], [1], [0, 0, 1, 1], [], []>} : vector<64x32xbf16>, vector<32x64xbf16>, vector<64x64xf32> -> vector<64x64xf32>
    %49 = arith.addf %43, %48 : vector<64x64xf32>
    %50 = vector.extract_strided_slice %6 {offsets = [2, 1, 0], sizes = [4, 16, 32], strides = [1, 1, 1]} : vector<6x18x32xbf16> to vector<4x16x32xbf16>
    %51 = vector.shape_cast %50 : vector<4x16x32xbf16> to vector<64x32xbf16>
    %c7 = arith.constant 7 : index
    %c0_33 = arith.constant 0 : index
    %c0_34 = arith.constant 0 : index
    %52 = vector.load %arg5[%c7, %c0_33, %c0_34] : memref<9x32x64xbf16, #tpu.memory_space<vmem>>, vector<1x32x64xbf16>
    %53 = vector.shape_cast %52 : vector<1x32x64xbf16> to vector<32x64xbf16>
    %cst_35 = arith.constant dense<0.000000e+00> : vector<64x64xf32>
    %54 = tpu.matmul %51, %53, %cst_35 {dimension_numbers = #tpu.dot_dimension_numbers<[1], [0], [0], [1], [0, 0, 1, 1], [], []>} : vector<64x32xbf16>, vector<32x64xbf16>, vector<64x64xf32> -> vector<64x64xf32>
    %55 = arith.addf %49, %54 : vector<64x64xf32>
    %56 = vector.extract_strided_slice %6 {offsets = [2, 2, 0], sizes = [4, 16, 32], strides = [1, 1, 1]} : vector<6x18x32xbf16> to vector<4x16x32xbf16>
    %57 = vector.shape_cast %56 : vector<4x16x32xbf16> to vector<64x32xbf16>
    %c8 = arith.constant 8 : index
    %c0_36 = arith.constant 0 : index
    %c0_37 = arith.constant 0 : index
    %58 = vector.load %arg5[%c8, %c0_36, %c0_37] : memref<9x32x64xbf16, #tpu.memory_space<vmem>>, vector<1x32x64xbf16>
    %59 = vector.shape_cast %58 : vector<1x32x64xbf16> to vector<32x64xbf16>
    %cst_38 = arith.constant dense<0.000000e+00> : vector<64x64xf32>
    %60 = tpu.matmul %57, %59, %cst_38 {dimension_numbers = #tpu.dot_dimension_numbers<[1], [0], [0], [1], [0, 0, 1, 1], [], []>} : vector<64x32xbf16>, vector<32x64xbf16>, vector<64x64xf32> -> vector<64x64xf32>
    %61 = arith.addf %55, %60 : vector<64x64xf32>
    %c0_39 = arith.constant 0 : index
    %c0_40 = arith.constant 0 : index
    %62 = vector.load %arg6[%c0_39, %c0_40] : memref<1x64xf32, #tpu.memory_space<vmem>>, vector<1x64xf32>
    %63 = vector.broadcast %62 : vector<1x64xf32> to vector<64x64xf32>
    %64 = arith.addf %61, %63 : vector<64x64xf32>
    %65 = vector.shape_cast %64 : vector<64x64xf32> to vector<4x16x64xf32>
    %66 = arith.truncf %65 : vector<4x16x64xf32> to vector<4x16x64xbf16>
    %c0_41 = arith.constant 0 : index
    %c0_42 = arith.constant 0 : index
    %c0_43 = arith.constant 0 : index
    %c0_44 = arith.constant 0 : index
    %67 = vector.load %arg7[%c0_41, %c0_42, %c0_43, %c0_44] : memref<1x4x16x64xbf16, #tpu.memory_space<vmem>>, vector<1x4x16x64xbf16>
    %68 = vector.shape_cast %67 : vector<1x4x16x64xbf16> to vector<4x16x64xbf16>
    %69 = vector.shape_cast %66 : vector<4x16x64xbf16> to vector<1x4x16x64xbf16>
    tpu.vector_store %arg7[%c0_41, %c0_42, %c0_43, %c0_44], %69 {strides = array<i32>} : memref<1x4x16x64xbf16, #tpu.memory_space<vmem>>, vector<1x4x16x64xbf16>,
    return
  }
  func.func @transform_0(%arg0: i32, %arg1: i32) -> (i32, i32, i32, i32) {
    %c0_i32 = arith.constant 0 : i32
    %c0_i32_0 = arith.constant 0 : i32
    %c0_i32_1 = arith.constant 0 : i32
    return %arg0, %arg1, %c0_i32, %c0_i32_0 : i32, i32, i32, i32
  }
  func.func @transform_1(%arg0: i32, %arg1: i32) -> (i32, i32, i32, i32) {
    %c1_i32 = arith.constant 1 : i32
    %0 = arith.addi %arg1, %c1_i32 : i32
    %c4_i32 = arith.constant 4 : i32
    %1 = arith.muli %0, %c4_i32 : i32
    %c0_i32 = arith.constant 0 : i32
    %c0_i32_0 = arith.constant 0 : i32
    %c0_i32_1 = arith.constant 0 : i32
    return %arg0, %1, %c0_i32, %c0_i32_0 : i32, i32, i32, i32
  }
  func.func @transform_2(%arg0: i32, %arg1: i32) -> (i32, i32, i32, i32) {
    %c1_i32 = arith.constant 1 : i32
    %0 = arith.addi %arg1, %c1_i32 : i32
    %c4_i32 = arith.constant 4 : i32
    %1 = arith.muli %0, %c4_i32 : i32
    %c1_i32_0 = arith.constant 1 : i32
    %2 = arith.addi %1, %c1_i32_0 : i32
    %c0_i32 = arith.constant 0 : i32
    %c0_i32_1 = arith.constant 0 : i32
    %c0_i32_2 = arith.constant 0 : i32
    return %arg0, %2, %c0_i32, %c0_i32_1 : i32, i32, i32, i32
  }
  func.func @transform_3(%arg0: i32, %arg1: i32) -> (i32, i32, i32) {
    %c0_i32 = arith.constant 0 : i32
    %c0_i32_0 = arith.constant 0 : i32
    %c0_i32_1 = arith.constant 0 : i32
    %c0_i32_2 = arith.constant 0 : i32
    return %c0_i32, %c0_i32_0, %c0_i32_1 : i32, i32, i32
  }
  func.func @transform_4(%arg0: i32, %arg1: i32) -> (i32, i32) {
    %c0_i32 = arith.constant 0 : i32
    %c0_i32_0 = arith.constant 0 : i32
    %c0_i32_1 = arith.constant 0 : i32
    return %c0_i32, %c0_i32_0 : i32, i32
  }
  func.func @transform_5(%arg0: i32, %arg1: i32) -> (i32, i32, i32, i32) {
    %c0_i32 = arith.constant 0 : i32
    %c0_i32_0 = arith.constant 0 : i32
    %c0_i32_1 = arith.constant 0 : i32
    return %arg0, %arg1, %c0_i32, %c0_i32_0 : i32, i32, i32, i32
  }
}

</mosaic_0001>

<bundles_post_ra>
// kernel: padded_conv2d_forward.1
= control target key start
LH: loop header
LB: loop body
LE: loop exit
PB: predicated region body
PF: predicated region fallthrough
CT: control target
= control target key end

     0   :  { %s2189_s18 = smov 0   ;;  %s2191_s19 = smov 0   ;;  %s2641_s0 = inlined_call_operand.vmem [shape: bf16[2,18,18,32], index: 0, kind: input, shape index: {}, may-alias: {0,1,2}]   ;;  %s2642_s1 = inlined_call_operand.vmem [shape: bf16[2,18,18,32], index: 1, kind: input, shape index: {}, may-alias: {0,1,2}]   ;;  %s2643_s2 = inlined_call_operand.vmem [shape: bf16[2,18,18,32], index: 2, kind: input, shape index: {}, may-alias: {0,1,2}]   ;;  %s2644_s3 = inlined_call_operand.vmem [shape: bf16[9,32,64], index: 3, kind: input, shape index: {}]   ;;  %s2645_s4 = inlined_call_operand.vmem [shape: f32[1,64], index: 4, kind: input, shape index: {}]   ;;  %s2646_s5 = inlined_call_operand.vmem [shape: bf16[2,16,16,64], index: 5, kind: output, shape index: {}]  }
   0x1   :  { %s2193_s20 = smov 0   ;;  %s2195_s21 = smov 0  }
   0x2   :  { %s2197_s22 = smov 0  }
   0x3 LB: > { %s24_s23 = sadd.s32 1, %s2149_s20  ;;  %s27_s24 = sadd.s32 1, %s2153_s21  ;;  %s2157_s22 = sphi %s2197_s22, %s15_s22   ;;  %s2153_s21 = sphi %s2195_s21, %s2654_s21   ;;  %s2149_s20 = sphi %s2193_s20, %s2653_s20   ;;  %s2145_s19 = sphi %s2191_s19, %s2652_s19   ;;  %s2141_s18 = sphi %s2189_s18, %s2651_s18  }
   0x4   : > { %p25_p0 = scmp.ge.s32.totalorder %s24_s23, 4  ;;  %p1733_p1 = scmp.ge.s32.totalorder %s2157_s22, 1 }
   0x5   : > { %p271_p2 = scmp.lt.s32.totalorder %s2157_s22, 9 }
   0x6   : > { %s2656_s23 = smov (%p25_p0, %s24_s23), 0  ;;  %s2658_s24 = smov (!%p25_p0, %s27_s24), %s2153_s21 }
   0x7   : > { %p272_p3 = pnand %p1733_p1, %p271_p2  ;;  %p29_p4 = scmp.ge.s32.totalorder %s2658_s24, 2 }
   0x8   : > { %s2222_s27 = sshll.u32 (!%p272_p3), %s2141_s18, 2  ;;  %p343_p5 = scmp.lt.s32.totalorder (!%p272_p3), %s2145_s19, 1 }
   0x9   : > { %s2660_s24 = smov (%p29_p4, %s2658_s24), 0  ;;  %275 = sbr.rel (%p272_p3) target bundleno = 320 (0x140), region = 40 }
   0xa   : > { %p345_p6 = scmp.lt.s32.totalorder (!%p272_p3), %s2222_s27, 17  ;;  %s2296_s17 = sadd.s32 (!%p272_p3), 4, %s2222_s27 }
   0xb   : > { %p362_p7 = scmp.lt.s32.totalorder (!%p272_p3), %s2296_s17, 17  ;;  %s373_s6 = sadd.s32 (!%p272_p3), 1, %s2296_s17 }
   0xc   : > { %p376_p8 = scmp.lt.s32.totalorder (!%p272_p3), %s373_s6, 17  ;;  %p389_p9 = scmp.lt.s32.totalorder (!%p272_p3), %s2222_s27, 15 }
   0xe   : > { %v2095_v0 = vld [vmem:[%s2644_s3 + $0x18] sm:$0xff]   ;;  %v2096_v1 = vld [vmem:[%s2644_s3 + $0x10] sm:$0xff]   ;;  %s2662_s19 = smov (!%p343_p5, %s2145_s19), 1  ;;  %v2234_v2 = vld [vmem:[%s2644_s3 + $0x8] sm:$0xff]   ;;  %vm420_vm0 = vsmask.f32 3328 }
   0xf   : > { %2047 = vmatprep.subr.bf16.mxu1 %v2095_v0  ;;  %1939 = vmatprep.subr.bf16.mxu0 %v2095_v0  ;;  %s346_s30 = scalar_select %p345_p6, %s2222_s27, 17  ;;  %v2242_v3 = vld [vmem:[%s2644_s3 + $0x28] sm:$0xff]   ;;  %vm421_vm1 = vsmask.f32 7440  ;;  %vm548_vm2 = vcmask 261120   ;;  %vm739_vm3 = vcmask 1042432  }
  0x10   : > { %2049 = vmatpush3.bf16.msra.mxu1 %v2095_v0  ;;  %1940 = vmatpush3.bf16.msra.mxu0 %v2095_v0  ;;  %s2237_s8 = smul.u32 54, %s2662_s19  ;;  %vm740_vm4 = vcmask 1046532   ;;  %vm2288_vm5 = vmor %vm420_vm0, %vm421_vm1  ;;  %s2664_s6 = smov (!%p376_p8, %s373_s6), 17  ;;  %v2114_v29 = vld [vmem:[%s2644_s3 + $0x78] sm:$0xff]   ;;  %vm1575_vm7 = vcmask 519168  }
  0x11   : > { %2048 = vmatprep.subr.bf16.mxu1 %v2096_v1  ;;  %1941 = vmatprep.subr.bf16.mxu0 %v2096_v1  ;;  %s2051_s11 = smul.u32 3, %s346_s30  ;;  %vm2335_vm6 = vmor %vm739_vm3, %vm740_vm4  ;;  %s2666_s27 = smov (!%p389_p9, %s2222_s27), 15 }
  0x12   : > { %s363_s18 = scalar_select %p362_p7, %s2296_s17, 17 }
  0x13   : > { %s349_s12 = sadd.s32 %s2237_s8, %s2051_s11  ;;  %s2054_s17 = smul.u32 3, %s2664_s6 }
  0x14   : > { %2050 = vmatpush3.bf16.msra.mxu1 %v2096_v1  ;;  %1942 = vmatpush3.bf16.msra.mxu0 %v2096_v1  ;;  %s1735_s13 = sshll.u32 %s349_s12, 2  ;;  %s2053_s25 = smul.u32 3, %s363_s18 }
  0x15   : > { %1951 = vmatprep.subr.bf16.mxu1 %v2234_v2  ;;  %1963 = vmatprep.subr.bf16.mxu0 %v2242_v3  ;;  %s2250_s16 = scalar_lea.vmem %s2641_s0, %s1735_s13  ;;  %s380_s26 = sadd.s32 %s2054_s17, %s2237_s8 }
  0x16   : > { %v2253_v4 = vld [vmem:[%s2250_s16] sm:$0xf]  ;;  %v2256_v5 = vld [vmem:[%s2250_s16 + $0x4] sm:$0xf]  ;;  %v2259_v6 = vld [vmem:[%s2250_s16 + $0x8] sm:$0x1]  ;;  %s366_s29 = sadd.s32 %s2053_s25, %s2237_s8 }
  0x17   : > { %v424_v7 = vshrl.u32 %v2253_v4, 16  ;;  %v427_v8 = vshll.u32 %v2253_v4, 16  ;;  %v433_v9 = vshll.u32 %v2256_v5, 16  ;;  %v437_v10 = vshrl.u32 %v2256_v5, 16  ;;  %v2266_v11 = vld [vmem:[%s2250_s16 + $0x18] sm:$0xf] }
  0x18   : > { %v443_v12 = vshll.u32 %v2259_v6, 16  ;;  %v2270_v13 = vld [vmem:[%s2250_s16 + $0x1c] sm:$0xf]  ;;  %v2273_v14 = vld [vmem:[%s2250_s16 + $0x20] sm:$0x1]  ;;  %v472_v20 = vshrl.u32 %v2266_v11, 16 }
  0x19   : > { %v426_v15 = vrot.slane %v424_v7, 4  ;;  %v429_v16 = vrot.slane %v427_v8, 5  ;;  %v435_v17 = vrot.slane %v433_v9, 5  ;;  %v439_v18 = vrot.slane %v437_v10, 4  ;;  %v2281_v27 = vld [vmem:[%s2250_s16 + $0xc] sm:$0xf] }
  0x1a   : > { %v445_v19 = vrot.slane %v443_v12, 5  ;;  %v475_v21 = vshll.u32 %v2266_v11, 16  ;;  %v481_v22 = vshll.u32 %v2270_v13, 16  ;;  %v485_v25 = vshrl.u32 %v2270_v13, 16  ;;  %v2284_v28 = vld [vmem:[%s2250_s16 + $0x10] sm:$0xf] }
  0x1b   : > { %v430_v23 = vor.u32 %v429_v16, %v426_v15  ;;  %v440_v24 = vor.u32 %v439_v18, %v435_v17  ;;  %v491_v26 = vshll.u32 %v2273_v14, 16  ;;  %v474_v30 = vrot.slane %v472_v20, 4  ;;  %v2293_v33 = vld [vmem:[%s2250_s16 + $0x14] sm:$0x1]  ;;  %v2299_v38 = vld [vmem:[%s2250_s16 + $0x24] sm:$0xf] }
  0x1c   : > { %v477_v31 = vrot.slane %v475_v21, 5  ;;  %v483_v32 = vrot.slane %v481_v22, 5  ;;  %v487_v36 = vrot.slane %v485_v25, 4  ;;  %v448_v40 = vshrl.u32 %v2281_v27, 16  ;;  %v2310_v47 = vld [vmem:[%s2250_s16 + $0x28] sm:$0xf] }
  0x1d   : > { %v431_v34 = vrot.slane %v430_v23, 4  ;;  %v441_v35 = vrot.slane %v440_v24, 4  ;;  %v493_v37 = vrot.slane %v491_v26, 5  ;;  %v451_v41 = vshll.u32 %v2281_v27, 16  ;;  %v2314_v52 = vld [vmem:[%s2250_s16 + $0x2c] sm:$0x1] }
  0x1e   : > { %v478_v39 = vor.u32 %v477_v31, %v474_v30  ;;  %v457_v42 = vshll.u32 %v2284_v28, 16  ;;  %v488_v45 = vor.u32 %v487_v36, %v483_v32  ;;  %v461_v46 = vshrl.u32 %v2284_v28, 16  ;;  %s1737_s30 = sshll.u32 %s366_s29, 2  ;;  %s1739_s28 = sshll.u32 %s380_s26, 2 }
  0x1f   : > { %v436_v43 = vsel %vm2288_vm5, %v431_v34, %v435_v17  ;;  %v446_v44 = vsel %vm2288_vm5, %v441_v35, %v445_v19  ;;  %v450_v50 = vrot.slane %v448_v40, 4  ;;  %v453_v51 = vrot.slane %v451_v41, 5  ;;  %v2100_v19 = vld [vmem:[%s2644_s3 + $0x20] sm:$0xff]   ;;  %s2379_s12 = scalar_lea.vmem %s2642_s1, %s1737_s30  ;;  %s382_s7 = scalar_lea.vmem %s2643_s2, %s1739_s28 }
  0x20   : > { %v1748_v48 = vcombine.low %v436_v43, %v446_v44  ;;  %v479_v49 = vrot.slane %v478_v39, 4  ;;  %v489_v53 = vrot.slane %v488_v45, 4  ;;  %v459_v54 = vrot.slane %v457_v42, 5  ;;  %s1741_s6 = sshll.u32 %s2666_s27, 1 }
  0x21   : > { %v463_v55 = vrot.slane %v461_v46, 4  ;;  %v467_v56 = vshll.u32 %v2293_v33, 16  ;;  %v747_v57 = vrot.slane %v2259_v6, 5  ;;  %v454_v59 = vor.u32 %v453_v51, %v450_v50  ;;  %v2104_v46 = vld [vmem:[%s2644_s3 + $0x48] sm:$0xff]  }
  0x22   : > { %1943 = vmatprep.mubr.msk.bf16.mxu0 %vm548_vm2, %v1748_v48  ;;  %v484_v58 = vsel %vm2288_vm5, %v479_v49, %v483_v32  ;;  %v496_v60 = vshrl.u32 %v2299_v38, 16  ;;  %v494_v61 = vsel %vm2288_vm5, %v489_v53, %v493_v37  ;;  %v499_v0 = vshll.u32 %v2299_v38, 16 }
  0x23   : > { %v464_v62 = vor.u32 %v463_v55, %v459_v54  ;;  %v469_v63 = vrot.slane %v467_v56, 5  ;;  %v2328_v1 = vcombine.low %v484_v58, %v494_v61  ;;  %v455_v7 = vrot.slane %v454_v59, 4  ;;  %v2108_v61 = vld [vmem:[%s2644_s3 + $0x40] sm:$0xff]  }
  0x24   : > { %v498_v8 = vrot.slane %v496_v60, 4  ;;  %v505_v6 = vshll.u32 %v2310_v47, 16  ;;  %v501_v10 = vrot.slane %v499_v0, 5  ;;  %v509_v12 = vshrl.u32 %v2310_v47, 16  ;;  %v2403_v60 = vld [vmem:[%s2379_s12] sm:$0xf] }
  0x25   : > { %v465_v9 = vrot.slane %v464_v62, 4  ;;  %v515_v15 = vshll.u32 %v2314_v52, 16  ;;  %1947 = vmatprep.mubr.msk.bf16.mxu1 %vm548_vm2, %v2328_v1  ;;  %v460_v17 = vsel %vm2288_vm5, %v455_v7, %v459_v54  ;;  %v1768_v20 = vrot.slane %v2253_v4, 9  ;;  %v2099_v54 = vld [vmem:[%s2644_s3] sm:$0xff]  }
  0x26   : > { %v507_v18 = vrot.slane %v505_v6, 5  ;;  %v744_v21 = vrot.slane %v2256_v5, 5  ;;  %v761_v22 = vrot.slane %v2273_v14, 5  ;;  %v502_v24 = vor.u32 %v501_v10, %v498_v8  ;;  %v2411_v62 = vld [vmem:[%s2379_s12 + $0x4] sm:$0xf]  ;;  %v2110_v10 = vld [vmem:[%s2644_s3 + $0x68] sm:$0xff]  }
  0x27   : > { %v470_v23 = vsel %vm2288_vm5, %v465_v9, %v469_v63  ;;  %v511_v25 = vrot.slane %v509_v12, 4  ;;  %v517_v30 = vrot.slane %v515_v15, 5  ;;  %v1769_v36 = vrot.slane %v2281_v27, 9  ;;  %v2443_v15 = vld [vmem:[%s382_s7] sm:$0xf] }
  0x28   : > { %v2352_v26 = vcombine.low %v460_v17, %v470_v23  ;;  %v745_v31 = vsel %vm2335_vm6, %v1768_v20, %v744_v21  ;;  %v746_v32 = vrot.slane %v744_v21, 4  ;;  %v503_v34 = vrot.slane %v502_v24, 4  ;;  %v2445_v17 = vld [vmem:[%s382_s7 + $0x8] sm:$0x1]  ;;  %v2452_v20 = vld [vmem:[%s382_s7 + $0x4] sm:$0xf] }
  0x29   : > { %v512_v35 = vor.u32 %v511_v25, %v507_v18  ;;  %v751_v14 = vrot.slane %v2284_v28, 5  ;;  %v754_v37 = vrot.slane %v2293_v33, 5  ;;  %v1770_v40 = vrot.slane %v2266_v11, 9  ;;  %v2459_v24 = vld [vmem:[%s2379_s12 + $0x8] sm:$0x1]  ;;  %s1742_s7 = sshll.u32 %s2662_s19, 5 }
  0x2a   : > { %1944 = vmatmul.mubr.msk.bf16.vlgmr.msra.gmra.mxu0 %vm548_vm2, %v2352_v26  ;;  %v748_v39 = vsel %vm2335_vm6, %v746_v32, %v747_v57  ;;  %v758_v41 = vrot.slane %v2270_v13, 5  ;;  %v508_v42 = vsel %vm2288_vm5, %v503_v34, %v507_v18  ;;  %v1758_v50 = vcombine.low %v2253_v4, %v2256_v5  ;;  %s393_s9 = sadd.s32 %s1742_s7, %s1741_s6 }
  0x2b   : > { %v513_v43 = vrot.slane %v512_v35, 4  ;;  %1964 = vmatpush3.bf16.msra.mxu0 %v2242_v3  ;;  %v1776_v44 = vcombine.low %v745_v31, %v748_v39  ;;  %v752_v45 = vsel %vm2335_vm6, %v1769_v36, %v751_v14  ;;  %v753_v33 = vrot.slane %v751_v14, 4  ;;  %v2109_v35 = vld [vmem:[%s2644_s3 + $0x58] sm:$0xff]   ;;  %s1743_s10 = sshll.u32 %s393_s9, 2 }
  0x2c   : > { %1965 = vmatprep.subr.bf16.mxu0 %v2100_v19  ;;  %v759_v48 = vsel %vm2335_vm6, %v1770_v40, %v758_v41  ;;  %v760_v49 = vrot.slane %v758_v41, 4  ;;  %v765_v51 = vrot.slane %v2310_v47, 5  ;;  %v1771_v57 = vrot.slane %v2299_v38, 9  ;;  %s2605_s12 = scalar_lea.vmem %s2646_s5, %s1743_s10 }
  0x2d   : > { %v518_v3 = vsel %vm2288_vm5, %v513_v43, %v517_v30  ;;  %1967 = vmatprep.mubr.msk.bf16.mxu0 %vm548_vm2, %v1776_v44  ;;  %v755_v55 = vsel %vm2335_vm6, %v753_v33, %v754_v37  ;;  %v768_v59 = vrot.slane %v2314_v52, 5  ;;  %v2102_v52 = vld [vmem:[%s2644_s3 + $0x38] sm:$0xff]   ;;  %v983_v63 = vshrl.u32 %v2403_v60, 16 }
  0x2e   : > { %v2387_v53 = vcombine.low %v508_v42, %v518_v3  ;;  %v762_v56 = vsel %vm2335_vm6, %v760_v49, %v761_v22  ;;  %v2397_v4 = vcombine.low %v752_v45, %v755_v55  ;;  %v767_v58 = vrot.slane %v765_v51, 4  ;;  %v2113_v49 = vld [vmem:[%s2644_s3 + $0x60] sm:$0xff]  }
  0x2f   : > { %1966 = vmatpush3.bf16.msra.mxu0 %v2100_v19  ;;  %v2399_v5 = vcombine.low %v759_v48, %v762_v56  ;;  %v986_v0 = vshll.u32 %v2403_v60, 16  ;;  %v996_v8 = vshrl.u32 %v2411_v62, 16  ;;  %v992_v6 = vshll.u32 %v2411_v62, 16 }
  0x30   : > { %1948 = vmatmul.mubr.msk.bf16.vlgmr.msra.gmra.mxu1 %vm548_vm2, %v2387_v53  ;;  %1987 = vmatprep.subr.bf16.mxu0 %v2104_v46  ;;  %v769_v7 = vsel %vm2335_vm6, %v767_v58, %v768_v59  ;;  %v1759_v9 = vcombine.low %v2281_v27, %v2284_v28  ;;  %v2441_v12 = vcombine.low %v2266_v11, %v2270_v13  ;;  %v2106_v27 = vld [vmem:[%s2644_s3 + $0x30] sm:$0xff]   ;;  %v985_v18 = vrot.slane %v983_v63, 4 }
  0x31   : > { %1952 = vmatpush3.bf16.msra.mxu1 %v2234_v2  ;;  %1955 = vmatprep.mubr.msk.bf16.mxu1 %vm548_vm2, %v1758_v50  ;;  %v766_v2 = vsel %vm2335_vm6, %v1771_v57, %v765_v51  ;;  %v988_v19 = vrot.slane %v986_v0, 5  ;;  %v1305_v21 = vshrl.u32 %v2443_v15, 16  ;;  %v994_v11 = vrot.slane %v992_v6, 5  ;;  %v2115_v51 = vld [vmem:[%s2644_s3 + $0x88] sm:$0xff]   ;;  %v2118_v57 = vld [vmem:[%s2644_s3 + $0x80] sm:$0xff]   ;;  %v2116_v63 = vld [vmem:[%s2644_s3 + $0x70] sm:$0xff]  }
  0x32   : > { %1953 = vmatprep.subr.bf16.mxu1 %v2099_v54  ;;  %1968 = vmatmul.mubr.msk.bf16.vlgmr.msra.gmra.mxu0 %vm548_vm2, %v2397_v4  ;;  %v2450_v28 = vcombine.low %v766_v2, %v769_v7  ;;  %v998_v13 = vrot.slane %v996_v8, 4  ;;  %v1308_v22 = vshll.u32 %v2443_v15, 16  ;;  %v1318_v23 = vshrl.u32 %v2452_v20, 16 }
  0x33   : > { %1988 = vmatpush3.bf16.msra.mxu0 %v2104_v46  ;;  %1971 = vmatprep.mubr.msk.bf16.mxu0 %vm548_vm2, %v2399_v5  ;;  %v1307_v25 = vrot.slane %v1305_v21, 4  ;;  %v1314_v30 = vshll.u32 %v2452_v20, 16  ;;  %v1324_v31 = vshll.u32 %v2445_v17, 16  ;;  %v989_v14 = vor.u32 %v988_v19, %v985_v18 }
  0x34   : > { %1989 = vmatprep.subr.bf16.mxu0 %v2108_v61  ;;  %v1310_v32 = vrot.slane %v1308_v22, 5  ;;  %v1320_v34 = vrot.slane %v1318_v23, 4  ;;  %v999_v37 = vor.u32 %v998_v13, %v994_v11  ;;  %v1002_v39 = vshll.u32 %v2459_v24, 16 }
  0x35   : > { %1954 = vmatpush3.bf16.msra.mxu1 %v2099_v54  ;;  %v1316_v36 = vrot.slane %v1314_v30, 5  ;;  %v1761_v41 = vcombine.low %v2299_v38, %v2310_v47  ;;  %v1326_v43 = vrot.slane %v1324_v31, 5  ;;  %v990_v33 = vrot.slane %v989_v14, 4  ;;  %v2111_v54 = vld [vmem:[%s2644_s3 + $0x50] sm:$0xff]  }
  0x36   : > { %1975 = vmatprep.subr.bf16.mxu1 %v2102_v52  ;;  %v1311_v40 = vor.u32 %v1310_v32, %v1307_v25  ;;  %v1000_v46 = vrot.slane %v999_v37, 4  ;;  %v1004_v48 = vrot.slane %v1002_v39, 5  ;;  %v1790_v56 = vcombine.low %v2403_v60, %v2411_v62 }
  0x37   : > { %1990 = vmatpush3.bf16.msra.mxu0 %v2108_v61  ;;  %v1321_v42 = vor.u32 %v1320_v34, %v1316_v36  ;;  %v995_v3 = vsel %vm2288_vm5, %v990_v33, %v994_v11  ;;  %v1105_v58 = vrot.slane %v2411_v62, 5  ;;  %v1808_v59 = vrot.slane %v2403_v60, 9 }
  0x38   : > { %1956 = vmatmul.mubr.msk.bf16.vlgmr.msra.gmra.mxu1 %vm548_vm2, %v1759_v9  ;;  %2011 = vmatprep.subr.bf16.mxu0 %v2110_v10  ;;  %v1312_v44 = vrot.slane %v1311_v40, 4  ;;  %v1005_v50 = vsel %vm2288_vm5, %v1000_v46, %v1004_v48  ;;  %v1427_v0 = vrot.slane %v2452_v20, 5  ;;  %v1842_v7 = vrot.slane %v2443_v15, 9 }
  0x39   : > { %1976 = vmatpush3.bf16.msra.mxu1 %v2102_v52  ;;  %1959 = vmatprep.mubr.msk.bf16.mxu1 %vm548_vm2, %v2441_v12  ;;  %v1322_v45 = vrot.slane %v1321_v42, 4  ;;  %v1801_v55 = vcombine.low %v995_v3, %v1005_v50  ;;  %v1107_v61 = vrot.slane %v1105_v58, 4  ;;  %v1108_v52 = vrot.slane %v2459_v24, 5 }
  0x3a   : > { %1977 = vmatprep.subr.bf16.mxu1 %v2106_v27  ;;  %1972 = vmatmul.mubr.msk.bf16.gmra.mxu0 %vm548_vm2, %v2450_v28  ;;  %v1106_v60 = vsel %vm2335_vm6, %v1808_v59, %v1105_v58  ;;  %v1429_v8 = vrot.slane %v1427_v0, 4  ;;  %v1430_v6 = vrot.slane %v2445_v17, 5 }
  0x3b   : > { %1991 = vmatprep.mubr.msk.bf16.mxu0 %vm548_vm2, %v2352_v26  ;;  %v1317_v26 = vsel %vm2288_vm5, %v1312_v44, %v1316_v36  ;;  %v1327_v38 = vsel %vm2288_vm5, %v1322_v45, %v1326_v43  ;;  %v1109_v62 = vsel %vm2335_vm6, %v1107_v61, %v1108_v52 }
  0x3c   : > { %v1835_v47 = vcombine.low %v1317_v26, %v1327_v38  ;;  %v1813_v2 = vcombine.low %v1106_v60, %v1109_v62 }
  0x3d   : > { %1978 = vmatpush3.bf16.msra.mxu1 %v2106_v27 }
  0x3e   : > { %1999 = vmatprep.subr.bf16.mxu1 %v2109_v35 }
  0x40   : > { %1960 = vmatmul.mubr.msk.bf16.gmra.mxu1 %vm548_vm2, %v1761_v41 }
  0x41   : > { %1979 = vmatprep.mubr.msk.bf16.mxu1 %vm548_vm2, %v1759_v9  ;;  %v1431_v9 = vsel %vm2335_vm6, %v1429_v8, %v1430_v6 }
  0x42   : > { %1992 = vmatmul.mubr.msk.bf16.vlgmr.msra.gmra.mxu0 %vm548_vm2, %v2328_v1 }
  0x43   : > { %2012 = vmatpush3.bf16.msra.mxu0 %v2110_v10  ;;  %1995 = vmatprep.mubr.msk.bf16.mxu0 %vm548_vm2, %v2387_v53 }
  0x44   : > { %2013 = vmatprep.subr.bf16.mxu0 %v2113_v49 }
  0x47   : > { %2014 = vmatpush3.bf16.msra.mxu0 %v2113_v49 }
  0x48   : > { %1980 = vmatmul.mubr.msk.bf16.vlgmr.msra.gmra.mxu1 %vm548_vm2, %v2441_v12  ;;  %2035 = vmatprep.subr.bf16.mxu0 %v2115_v51 }
  0x49   : > { %2000 = vmatpush3.bf16.msra.mxu1 %v2109_v35  ;;  %1983 = vmatprep.mubr.msk.bf16.mxu1 %vm548_vm2, %v1761_v41 }
  0x4a   : > { %2001 = vmatprep.subr.bf16.mxu1 %v2111_v54  ;;  %1996 = vmatmul.mubr.msk.bf16.gmra.mxu0 %vm548_vm2, %v1801_v55 }
  0x4b   : > { %2015 = vmatprep.mubr.msk.bf16.mxu0 %vm548_vm2, %v2441_v12 }
  0x4d   : > { %2002 = vmatpush3.bf16.msra.mxu1 %v2111_v54 }
  0x4e   : > { %2023 = vmatprep.subr.bf16.mxu1 %v2114_v29 }
  0x50   : > { %1984 = vmatmul.mubr.msk.bf16.gmra.mxu1 %vm548_vm2, %v1790_v56 }
  0x51   : > { %2003 = vmatprep.mubr.msk.bf16.mxu1 %vm548_vm2, %v2397_v4  ;;  %v1824_v4 = vcombine.low %v2443_v15, %v2452_v20 }
  0x52   : > { %2016 = vmatmul.mubr.msk.bf16.vlgmr.msra.gmra.mxu0 %vm548_vm2, %v1761_v41 }
  0x53   : > { %2036 = vmatpush3.bf16.msra.mxu0 %v2115_v51  ;;  %2019 = vmatprep.mubr.msk.bf16.mxu0 %vm548_vm2, %v1790_v56 }
  0x54   : > { %2037 = vmatprep.subr.bf16.mxu0 %v2118_v57 }
  0x57   : > { %2038 = vmatpush3.bf16.msra.mxu0 %v2118_v57 }
  0x58   : > { %2004 = vmatmul.mubr.msk.bf16.vlgmr.msra.gmra.mxu1 %vm548_vm2, %v2399_v5 }
  0x59   : > { %2024 = vmatpush3.bf16.msra.mxu1 %v2114_v29  ;;  %2007 = vmatprep.mubr.msk.bf16.mxu1 %vm548_vm2, %v2450_v28 }
  0x5a   : > { %2025 = vmatprep.subr.bf16.mxu1 %v2116_v63  ;;  %2020 = vmatmul.mubr.msk.bf16.gmra.mxu0 %vm548_vm2, %v1824_v4 }
  0x5b   : > { %2039 = vmatprep.mubr.msk.bf16.mxu0 %vm548_vm2, %v2399_v5  ;;  %v1428_v5 = vsel %vm2335_vm6, %v1842_v7, %v1427_v0 }
  0x5c   : > { %v1847_v10 = vcombine.low %v1428_v5, %v1431_v9 }
  0x5d   : > { %2026 = vmatpush3.bf16.msra.mxu1 %v2116_v63 }
  0x60   : > { %2008 = vmatmul.mubr.msk.bf16.gmra.mxu1 %vm548_vm2, %v1813_v2 }
  0x61   : > { %2027 = vmatprep.mubr.msk.bf16.mxu1 %vm548_vm2, %v2328_v1 }
  0x62   : > { %2040 = vmatmul.mubr.msk.bf16.vlgmr.msra.gmra.mxu0 %vm548_vm2, %v2450_v28 }
  0x63   : > { %2043 = vmatprep.mubr.msk.bf16.mxu0 %vm548_vm2, %v1813_v2 }
  0x68   : > { %2028 = vmatmul.mubr.msk.bf16.vlgmr.msra.gmra.mxu1 %vm548_vm2, %v2387_v53 }
  0x69   : > { %2031 = vmatprep.mubr.msk.bf16.mxu1 %vm548_vm2, %v1801_v55 }
  0x6a   : > { %2044 = vmatmul.mubr.msk.bf16.gmra.mxu0 %vm548_vm2, %v1847_v10 }
  0x70   : > { %2032 = vmatmul.mubr.msk.bf16.gmra.mxu1 %vm548_vm2, %v1835_v47 }
  0xea   : > { %v1945_v1 = vpop.f32.mrf.mxu0 }
  0xec   : > { %v595_v12 = vpop.f32.mrf.mxu0 }
  0xee   : > { %v1946_v15 = vpop.f32.mrf.mxu0 }
  0xf0   : > { %v1949_v17 = vpop.f32.mrf.mxu1  ;;  %v598_v27 = vpop.f32.mrf.mxu0 }
  0xf2   : > { %v611_v28 = vpop.f32.mrf.mxu1  ;;  %v1969_v18 = vpop.f32.mrf.mxu0 }
  0xf4   : > { %v2554_v19 = vpop.f32.mrf.mxu1  ;;  %v845_v16 = vpop.f32.mrf.mxu0 }
  0xf6   : > { %v2556_v20 = vpop.f32.mrf.mxu1  ;;  %v1970_v21 = vpop.f32.mrf.mxu0 }
  0xf8   : > { %v1957_v53 = vpop.f32.mrf.mxu1  ;;  %v848_v11 = vpop.f32.mrf.mxu0 }
  0xf9   : > { %v713_v54 = vadd.f32 %v1957_v53, %v1945_v1 }
  0xfa   : > { %v704_v13 = vpop.f32.mrf.mxu1  ;;  %v1973_v22 = vpop.f32.mrf.mxu0 }
  0xfb   : > { %v705_v56 = vadd.f32 %v704_v13, %v595_v12  ;;  %v878_v59 = vadd.f32 %v1969_v18, %v713_v54 }
  0xfc   : > { %v1958_v23 = vpop.f32.mrf.mxu1  ;;  %v861_v24 = vpop.f32.mrf.mxu0 }
  0xfd   : > { %v716_v61 = vadd.f32 %v1958_v23, %v1946_v15  ;;  %v876_v4 = vadd.f32 %v845_v16, %v705_v56 }
  0xfe   : > { %v707_v25 = vpop.f32.mrf.mxu1  ;;  %v2558_v30 = vpop.f32.mrf.mxu0 }
  0xff   : > { %v708_v60 = vadd.f32 %v707_v25, %v598_v27  ;;  %v879_v8 = vadd.f32 %v1970_v21, %v716_v61 }
 0x100   : > { %v1961_v31 = vpop.f32.mrf.mxu1  ;;  %v2560_v32 = vpop.f32.mrf.mxu0 }
 0x101   : > { %v729_v0 = vadd.f32 %v1961_v31, %v1949_v17  ;;  %v877_v1 = vadd.f32 %v848_v11, %v708_v60 }
 0x102   : > { %v720_v34 = vpop.f32.mrf.mxu1  ;;  %v1993_v35 = vpop.f32.mrf.mxu0 }
 0x103   : > { %v721_v5 = vadd.f32 %v720_v34, %v611_v28  ;;  %v882_v27 = vadd.f32 %v1973_v22, %v729_v0 }
 0x104   : > { %v1962_v36 = vpop.f32.mrf.mxu1  ;;  %v1063_v14 = vpop.f32.mrf.mxu0 }
 0x105   : > { %v732_v18 = vadd.f32 %v1962_v36, %v2554_v19  ;;  %v880_v23 = vadd.f32 %v861_v24, %v721_v5 }
 0x106   : > { %v723_v37 = vpop.f32.mrf.mxu1  ;;  %v1994_v39 = vpop.f32.mrf.mxu0 }
 0x107   : > { %v724_v28 = vadd.f32 %v723_v37, %v2556_v20 }
 0x108   : > { %v1981_v40 = vpop.f32.mrf.mxu1  ;;  %v1066_v41 = vpop.f32.mrf.mxu0 }
 0x109   : > { %v976_v62 = vadd.f32 %v1981_v40, %v878_v59  ;;  %v883_v40 = vadd.f32 %v2558_v30, %v732_v18 }
 0x10a   : > { %v943_v42 = vpop.f32.mrf.mxu1  ;;  %v2562_v43 = vpop.f32.mrf.mxu0 }
 0x10b   : > { %v974_v6 = vadd.f32 %v943_v42, %v876_v4  ;;  %v1096_v12 = vadd.f32 %v1993_v35, %v976_v62 }
 0x10c   : > { %v1982_v44 = vpop.f32.mrf.mxu1  ;;  %v2564_v45 = vpop.f32.mrf.mxu0 }
 0x10d   : > { %v977_v15 = vadd.f32 %v1982_v44, %v879_v8  ;;  %v1094_v53 = vadd.f32 %v1063_v14, %v974_v6 }
 0x10e   : > { %v946_v33 = vpop.f32.mrf.mxu1  ;;  %v2566_v46 = vpop.f32.mrf.mxu0 }
 0x10f   : > { %v975_v13 = vadd.f32 %v946_v33, %v877_v1  ;;  %v1097_v34 = vadd.f32 %v1994_v39, %v977_v15  ;;  %v881_v33 = vadd.f32 %v2560_v32, %v724_v28 }
 0x110   : > { %v1985_v48 = vpop.f32.mrf.mxu1  ;;  %v2568_v26 = vpop.f32.mrf.mxu0 }
 0x111   : > { %v980_v25 = vadd.f32 %v1985_v48, %v882_v27  ;;  %v1095_v36 = vadd.f32 %v1066_v41, %v975_v13  ;;  %v1854_v41 = vld [vmem:[%s2645_s4] ss:$0 sm:$0xff] }
 0x112   : > { %v959_v49 = vpop.f32.mrf.mxu1  ;;  %v2017_v38 = vpop.f32.mrf.mxu0 }
 0x113   : > { %v978_v22 = vadd.f32 %v959_v49, %v880_v23  ;;  %v1100_v24 = vadd.f32 %v2562_v43, %v980_v25 }
 0x114   : > { %v1986_v47 = vpop.f32.mrf.mxu1  ;;  %v1265_v3 = vpop.f32.mrf.mxu0 }
 0x115   : > { %v981_v20 = vadd.f32 %v1986_v47, %v883_v40  ;;  %v1098_v56 = vadd.f32 %v2564_v45, %v978_v22 }
 0x116   : > { %v962_v50 = vpop.f32.mrf.mxu1  ;;  %v2570_v51 = vpop.f32.mrf.mxu0 }
 0x117   : > { %v979_v30 = vadd.f32 %v962_v50, %v881_v33 }
 0x118   : > { %v2005_v55 = vpop.f32.mrf.mxu1  ;;  %v2572_v29 = vpop.f32.mrf.mxu0 }
 0x119   : > { %v1200_v21 = vadd.f32 %v2005_v55, %v1096_v12  ;;  %v1099_v60 = vadd.f32 %v2568_v26, %v979_v30 }
 0x11a   : > { %v1167_v57 = vpop.f32.mrf.mxu1  ;;  %v2574_v58 = vpop.f32.mrf.mxu0 }
 0x11b   : > { %v1198_v35 = vadd.f32 %v1167_v57, %v1094_v53  ;;  %v1298_v44 = vadd.f32 %v2017_v38, %v1200_v21  ;;  %v1101_v57 = vadd.f32 %v2566_v46, %v981_v20 }
 0x11c   : > { %v2006_v52 = vpop.f32.mrf.mxu1  ;;  %v2576_v63 = vpop.f32.mrf.mxu0 }
 0x11d   : > { %v1201_v14 = vadd.f32 %v2006_v52, %v1097_v34  ;;  %v1296_v39 = vadd.f32 %v1265_v3, %v1198_v35 }
 0x11e   : > { %v1170_v2 = vpop.f32.mrf.mxu1  ;;  %v2579_v7 = vpop.f32.mrf.mxu0 }
 0x11f   : > { %v1199_v54 = vadd.f32 %v1170_v2, %v1095_v36  ;;  %v1299_v32 = vadd.f32 %v2570_v51, %v1201_v14 }
 0x120   : > { %v2009_v9 = vpop.f32.mrf.mxu1  ;;  %v2581_v10 = vpop.f32.mrf.mxu0 }
 0x121   : > { %v1204_v49 = vadd.f32 %v2009_v9, %v1100_v24  ;;  %v1297_v52 = vadd.f32 %v2572_v29, %v1199_v54 }
 0x122   : > { %v1183_v17 = vpop.f32.mrf.mxu1  ;;  %v2041_v16 = vpop.f32.mrf.mxu0 }
 0x123   : > { %v1202_v59 = vadd.f32 %v1183_v17, %v1098_v56  ;;  %v1302_v62 = vadd.f32 %v2574_v58, %v1204_v49 }
 0x124   : > { %v2010_v31 = vpop.f32.mrf.mxu1  ;;  %v1489_v11 = vpop.f32.mrf.mxu0 }
 0x125   : > { %v1205_v0 = vadd.f32 %v2010_v31, %v1101_v57  ;;  %v1300_v6 = vadd.f32 %v2576_v63, %v1202_v59 }
 0x126   : > { %v1186_v42 = vpop.f32.mrf.mxu1  ;;  %v2042_v19 = vpop.f32.mrf.mxu0 }
 0x127   : > { %v1203_v5 = vadd.f32 %v1186_v42, %v1099_v60  ;;  %v1303_v27 = vadd.f32 %v2579_v7, %v1205_v0 }
 0x128   : > { %v2029_v37 = vpop.f32.mrf.mxu1  ;;  %v1492_v48 = vpop.f32.mrf.mxu0 }
 0x129   : > { %v1418_v55 = vadd.f32 %v2029_v37, %v1298_v44  ;;  %v1301_v13 = vadd.f32 %v2581_v10, %v1203_v5 }
 0x12a   : > { %v1385_v38 = vpop.f32.mrf.mxu1  ;;  %v2045_v61 = vpop.f32.mrf.mxu0 }
 0x12b   : > { %v1522_v43 = vadd.f32 %v2041_v16, %v1418_v55  ;;  %v1416_v47 = vadd.f32 %v1385_v38, %v1296_v39 }
 0x12c   : > { %v2030_v3 = vpop.f32.mrf.mxu1  ;;  %v1505_v9 = vpop.f32.mrf.mxu0 }
 0x12d   : > { %v1537_v45 = vadd.f32 %v1854_v41, %v1522_v43  ;;  %v1520_v50 = vadd.f32 %v1489_v11, %v1416_v47  ;;  %v1419_v4 = vadd.f32 %v2030_v3, %v1299_v32 }
 0x12e   : > { %v1388_v46 = vpop.f32.mrf.mxu1  ;;  %v2046_v23 = vpop.f32.mrf.mxu0 }
 0x12f   : > { %v1879_v51 = vpack.c.bf16 %v1537_v45, %v1537_v45  ;;  %v1535_v2 = vadd.f32 %v1854_v41, %v1520_v50  ;;  %v1523_v29 = vadd.f32 %v2042_v19, %v1419_v4  ;;  %v1417_v8 = vadd.f32 %v1388_v46, %v1297_v52 }
 0x130   : > { %v2033_v26 = vpop.f32.mrf.mxu1  ;;  %v1508_v42 = vpop.f32.mrf.mxu0 }
 0x131   : > { %1578 = vst.msk [vmem:[%s2605_s12 + $0x8] sm:$0xf] %vm1575_vm7, %v1879_v51  ;;  %v1877_v58 = vpack.c.bf16 %v1535_v2, %v1535_v2  ;;  %v1538_v1 = vadd.f32 %v1854_v41, %v1523_v29  ;;  %v1521_v12 = vadd.f32 %v1492_v48, %v1417_v8  ;;  %v1422_v15 = vadd.f32 %v2033_v26, %v1302_v62 }
 0x132   : > { %v1401_v18 = vpop.f32.mrf.mxu1 }
 0x133   : > { %1576 = vst.msk [vmem:[%s2605_s12] sm:$0xf] %vm1575_vm7, %v1877_v58  ;;  %v1880_v17 = vpack.c.bf16 %v1538_v1, %v1538_v1  ;;  %v1536_v16 = vadd.f32 %v1854_v41, %v1521_v12  ;;  %v1526_v53 = vadd.f32 %v2045_v61, %v1422_v15  ;;  %v1420_v63 = vadd.f32 %v1401_v18, %v1300_v6 }
 0x134   : > { %v2034_v21 = vpop.f32.mrf.mxu1 }
 0x135   : > { %1579 = vst.msk [vmem:[%s2605_s12 + $0xc] sm:$0xf] %vm1575_vm7, %v1880_v17  ;;  %v1878_v28 = vpack.c.bf16 %v1536_v16, %v1536_v16  ;;  %v1541_v25 = vadd.f32 %v1854_v41, %v1526_v53  ;;  %v1524_v31 = vadd.f32 %v1505_v9, %v1420_v63  ;;  %v1423_v7 = vadd.f32 %v2034_v21, %v1303_v27 }
 0x136   : > { %v1404_v11 = vpop.f32.mrf.mxu1 }
 0x137   : > { %1577 = vst.msk [vmem:[%s2605_s12 + $0x4] sm:$0xf] %vm1575_vm7, %v1878_v28  ;;  %v1883_v34 = vpack.c.bf16 %v1541_v25, %v1541_v25  ;;  %v1539_v35 = vadd.f32 %v1854_v41, %v1524_v31  ;;  %v1527_v40 = vadd.f32 %v2046_v23, %v1423_v7  ;;  %v1421_v22 = vadd.f32 %v1404_v11, %v1301_v13 }
 0x139   : > { %1582 = vst.msk [vmem:[%s2605_s12 + $0x18] sm:$0xf] %vm1575_vm7, %v1883_v34  ;;  %v1881_v10 = vpack.c.bf16 %v1539_v35, %v1539_v35  ;;  %v1542_v19 = vadd.f32 %v1854_v41, %v1527_v40  ;;  %v1525_v36 = vadd.f32 %v1508_v42, %v1421_v22 }
 0x13b   : > { %1580 = vst.msk [vmem:[%s2605_s12 + $0x10] sm:$0xf] %vm1575_vm7, %v1881_v10  ;;  %v1884_v44 = vpack.c.bf16 %v1542_v19, %v1542_v19  ;;  %v1540_v14 = vadd.f32 %v1854_v41, %v1525_v36 }
 0x13d   : > { %1583 = vst.msk [vmem:[%s2605_s12 + $0x1c] sm:$0xf] %vm1575_vm7, %v1884_v44  ;;  %v1882_v33 = vpack.c.bf16 %v1540_v14, %v1540_v14 }
 0x13f   : > { %1581 = vst.msk [vmem:[%s2605_s12 + $0x14] sm:$0xf] %vm1575_vm7, %v1882_v33 }
 0x140 PF: > { %s15_s22 = sadd.s32 1, %s2157_s22   ;;  %s2651_s18 = smov %s2149_s20 }
 0x141   : > { %p12_p10 = scmp.ge.s32.totalorder %s15_s22, 10   ;;  %s2652_s19 = smov %s2153_s21 }
 0x142   : > { %s2653_s20 = smov %s2656_s23  ;;  %s2654_s21 = smov %s2660_s24 }
 0x143   :  { %14 = sbr.rel (!%p12_p10) target bundleno = 3 (0x3), region = 84 }

</bundles_post_ra>
